<compile_context>
chip_gen: v7x
topology: tpu7x:2x2x1
jax: 0.10.0
libtpu: 0.0.40
codegen_flags: <defaults>
</compile_context>

<pallas_src>
import functools

import jax
import jax.numpy as jnp
from jax.experimental import pallas as pl
from jax.experimental.pallas import tpu as pltpu


def _round_up(x, m):
    return ((x + m - 1) // m) * m


def rnn_kernel(xw_ref, w_hh_ref, w_fc_ref, b_fc_ref, out_ref, h_ref, *, seq_len, chunk):
    """One grid step advances the recurrence by `chunk` timesteps.

    xw_ref:   (chunk, B_pad, H_pad)  precomputed x_t @ W_ih + b_ih + b_hh (streamed)
    w_hh_ref: (H_pad, H_pad)         recurrence weight (VMEM resident)
    w_fc_ref: (H_pad, O_pad)         fc weight (VMEM resident)
    b_fc_ref: (1, O_pad)             fc bias (VMEM resident)
    out_ref:  (B_pad, O_pad)         fc(final hidden), written on the last chunk
    h_ref:    (B_pad, H_pad) f32     hidden state carried across grid steps
    """
    c = pl.program_id(0)

    @pl.when(c == 0)
    def _init():
        h_ref[...] = jnp.zeros_like(h_ref)

    w_hh = w_hh_ref[...]          # loaded once; reused by every unrolled step
    base = c * chunk

    def step(i, h):
        # Serial chain per step: matmul -> add -> tanh (input projection is precomputed).
        pre = jnp.dot(h, w_hh, preferred_element_type=jnp.float32)
        pre = pre + xw_ref[i].astype(jnp.float32)
        h_new = jnp.tanh(pre)
        if seq_len % chunk == 0:
            return h_new
        # Guard padded tail timesteps (S rounded up to a multiple of `chunk`).
        return jnp.where(base + i < seq_len, h_new, h)

    h_final = jax.lax.fori_loop(0, chunk, step, h_ref[...], unroll=True)
    h_ref[...] = h_final

    @pl.when(c == pl.num_programs(0) - 1)
    def _finalize():
        out_ref[...] = (
            jnp.dot(h_final.astype(w_fc_ref.dtype), w_fc_ref[...],
                    preferred_element_type=jnp.float32)
            + b_fc_ref[...]
        ).astype(out_ref.dtype)


def prepare_rnn_params(emb_table, w_ih, w_hh, b_ih, b_hh, w_fc, b_fc, *,
                       x_dtype=jnp.float32):
    """One-time (per parameter set) folding + padding; independent of sequence length."""
    _, E = emb_table.shape
    H = w_ih.shape[1]
    O = w_fc.shape[1]
    H_pad = _round_up(H, 128)
    O_pad = _round_up(O, 128)

    # Fold embedding + input projection + both recurrence biases into one table:
    #   xw_table[v] = emb_table[v] @ W_ih + b_ih + b_hh      (exact in f32)
    xw_table = emb_table @ w_ih + (b_ih + b_hh)[None, :]                 # (V, H)
    xw_table = jnp.pad(xw_table, ((0, 0), (0, H_pad - H))).astype(x_dtype)

    w_hh_p = jnp.pad(w_hh, ((0, H_pad - H), (0, H_pad - H)))
    w_fc_p = jnp.pad(w_fc, ((0, H_pad - H), (0, O_pad - O)))
    b_fc_p = jnp.pad(b_fc[None, :], ((0, 0), (0, O_pad - O)))

    return dict(xw_table=xw_table, w_hh=w_hh_p, w_fc=w_fc_p, b_fc=b_fc_p,
                H=H, O=O, H_pad=H_pad, O_pad=O_pad)


def rnn_forward_pallas(tokens, params, *, chunk=16):
    """tokens: (S, B) int32 (seq-major, like nn.RNN default). Returns fc(final hidden): (B, O)."""
    S, B = tokens.shape
    H_pad, O_pad, O = params["H_pad"], params["O_pad"], params["O"]
    B_pad = _round_up(max(B, 1), 8)

    chunk = max(1, min(chunk, S))
    n_chunks = -(-S // chunk)
    S_pad = n_chunks * chunk

    # Per-step input contribution via gather of the precomputed table (JAX glue; see TODO
    # about moving this gather in-kernel with scalar-prefetched ids).
    xw = jnp.take(params["xw_table"], tokens, axis=0)                    # (S, B, H_pad)
    xw = jnp.pad(xw, ((0, S_pad - S), (0, B_pad - B), (0, 0)))           # (S_pad, B_pad, H_pad)

    kernel = functools.partial(rnn_kernel, seq_len=S, chunk=chunk)

    out_padded = pl.pallas_call(
        kernel,
        out_shape=jax.ShapeDtypeStruct((B_pad, O_pad), jnp.float32),
        grid_spec=pltpu.PrefetchScalarGridSpec(
            num_scalar_prefetch=0,
            grid=(n_chunks,),
            in_specs=[
                pl.BlockSpec((chunk, B_pad, H_pad), lambda s: (s, 0, 0)),  # streamed xw chunk
                pl.BlockSpec((H_pad, H_pad), lambda s: (0, 0)),            # W_hh (resident)
                pl.BlockSpec((H_pad, O_pad), lambda s: (0, 0)),            # fc weight
                pl.BlockSpec((1, O_pad), lambda s: (0, 0)),                # fc bias
            ],
            out_specs=pl.BlockSpec((B_pad, O_pad), lambda s: (0, 0)),
            scratch_shapes=[pltpu.VMEM((B_pad, H_pad), jnp.float32)],      # hidden carry
        ),
        compiler_params=pltpu.CompilerParams(
            dimension_semantics=("arbitrary",),          # sequential carried dependence
            vmem_limit_bytes=32 * 1024 * 1024,
        ),
    )(xw, params["w_hh"], params["w_fc"], params["b_fc"])

    return out_padded[:B, :O]


def rnn_forward_reference(tokens, emb_table, w_ih, w_hh, b_ih, b_hh, w_fc, b_fc):
    embedded = jnp.take(emb_table, tokens, axis=0)  # (S, B, E)
    B = tokens.shape[1]
    H = w_ih.shape[1]

    def step(h, x_t):
        return jnp.tanh(x_t @ w_ih + h @ w_hh + b_ih + b_hh), None

    h0 = jnp.zeros((B, H), jnp.float32)
    h_final, _ = jax.lax.scan(step, h0, embedded)
    return h_final @ w_fc + b_fc


if __name__ == "__main__":
    # Small shapes consistent with the module's forward pass.
    vocab_size = 50       # input_dim (len(text.vocab))
    embedding_dim = 32
    hidden_dim = 64
    output_dim = 1
    seq_len = 20          # not a multiple of chunk -> exercises multi-chunk grid + tail guard
    batch = 4

    key = jax.random.PRNGKey(0)
    k_emb, k_wih, k_whh, k_bih, k_bhh, k_wfc, k_bfc, k_tok = jax.random.split(key, 8)

    emb_table = jax.random.normal(k_emb, (vocab_size, embedding_dim), jnp.float32) * 0.1
    # Weights stored as (in, out); PyTorch stores (out, in) and computes x @ W.T — same math.
    w_ih = jax.random.normal(k_wih, (embedding_dim, hidden_dim), jnp.float32) * 0.1
    w_hh = jax.random.normal(k_whh, (hidden_dim, hidden_dim), jnp.float32) * 0.1
    b_ih = jax.random.normal(k_bih, (hidden_dim,), jnp.float32) * 0.1
    b_hh = jax.random.normal(k_bhh, (hidden_dim,), jnp.float32) * 0.1
    w_fc = jax.random.normal(k_wfc, (hidden_dim, output_dim), jnp.float32) * 0.1
    b_fc = jax.random.normal(k_bfc, (output_dim,), jnp.float32) * 0.1

    tokens = jax.random.randint(k_tok, (seq_len, batch), 0, vocab_size, jnp.int32)

    params = prepare_rnn_params(emb_table, w_ih, w_hh, b_ih, b_hh, w_fc, b_fc)
    out = rnn_forward_pallas(tokens, params, chunk=8)
    out = jax.block_until_ready(out)

    ref = rnn_forward_reference(tokens, emb_table, w_ih, w_hh, b_ih, b_hh, w_fc, b_fc)
    assert out.shape == (batch, output_dim)
    assert jnp.allclose(out, ref, atol=1e-5, rtol=1e-5), jnp.max(jnp.abs(out - ref))

    print("KERNEL_OK")
</pallas_src>

<mosaic_0001>
module attributes {stable_mosaic.version = 11 : i64} {
  func.func @rnn_kernel(%arg0: i32, %arg1: memref<8x8x128xf32, #tpu.memory_space<vmem>>, %arg2: memref<128x128xf32, #tpu.memory_space<vmem>>, %arg3: memref<128x128xf32, #tpu.memory_space<vmem>>, %arg4: memref<1x128xf32, #tpu.memory_space<vmem>>, %arg5: memref<8x128xf32, #tpu.memory_space<vmem>>, %arg6: memref<8x128xf32, #tpu.memory_space<vmem>>) attributes {dimension_semantics = [#tpu.dimension_semantics<arbitrary>], iteration_bounds = array<i64: 3>, scalar_prefetch = 0 : i64, scratch_operands = 1 : i64, tpu.core_type = #tpu.core_type<tc>, window_params = [{transform_indices = @transform_0, window_bounds = array<i64: 8, 8, 128>}, {pipeline_mode = #tpu.pipeline_mode<synchronous>, transform_indices = @transform_1, window_bounds = array<i64: 128, 128>}, {pipeline_mode = #tpu.pipeline_mode<synchronous>, transform_indices = @transform_2, window_bounds = array<i64: 128, 128>}, {pipeline_mode = #tpu.pipeline_mode<synchronous>, transform_indices = @transform_3, window_bounds = array<i64: 1, 128>}, {pipeline_mode = #tpu.pipeline_mode<synchronous>, transform_indices = @transform_4, window_bounds = array<i64: 8, 128>}]} {
    %c0_i32 = arith.constant 0 : i32
    %0 = arith.cmpi eq, %arg0, %c0_i32 : i32
    %1 = arith.extui %0 : i1 to i32
    %c0_i32_0 = arith.constant 0 : i32
    %2 = arith.cmpi ne, %1, %c0_i32_0 : i32
    scf.if %2 {
      %cst_40 = arith.constant 0.000000e+00 : f32
      %82 = vector.broadcast %cst_40 : f32 to vector<8x128xf32>
      %c0_41 = arith.constant 0 : index
      %c0_42 = arith.constant 0 : index
      %83 = vector.load %arg6[%c0_41, %c0_42] : memref<8x128xf32, #tpu.memory_space<vmem>>, vector<8x128xf32>
      tpu.vector_store %arg6[%c0_41, %c0_42], %82 {strides = array<i32>} : memref<8x128xf32, #tpu.memory_space<vmem>>, vector<8x128xf32>,
    } else {
    }
    %c0 = arith.constant 0 : index
    %c0_1 = arith.constant 0 : index
    %3 = vector.load %arg2[%c0, %c0_1] : memref<128x128xf32, #tpu.memory_space<vmem>>, vector<128x128xf32>
    %c8_i32 = arith.constant 8 : i32
    %4 = arith.muli %arg0, %c8_i32 : i32
    %c0_2 = arith.constant 0 : index
    %c0_3 = arith.constant 0 : index
    %5 = vector.load %arg6[%c0_2, %c0_3] : memref<8x128xf32, #tpu.memory_space<vmem>>, vector<8x128xf32>
    %c0_i32_4 = arith.constant 0 : i32
    %cst = arith.constant dense<0.000000e+00> : vector<8x128xf32>
    %6 = tpu.matmul %5, %3, %cst {dimension_numbers = #tpu.dot_dimension_numbers<[1], [0], [0], [1], [0, 0, 1, 1], [], []>} : vector<8x128xf32>, vector<128x128xf32>, vector<8x128xf32> -> vector<8x128xf32>
    %7 = arith.index_cast %c0_i32_4 : i32 to index
    %c0_5 = arith.constant 0 : index
    %c0_6 = arith.constant 0 : index
    %8 = vector.load %arg1[%7, %c0_5, %c0_6] : memref<8x8x128xf32, #tpu.memory_space<vmem>>, vector<1x8x128xf32>
    %9 = vector.shape_cast %8 : vector<1x8x128xf32> to vector<8x128xf32>
    %10 = arith.addf %6, %9 : vector<8x128xf32>
    %11 = math.tanh %10 : vector<8x128xf32>
    %12 = arith.addi %4, %c0_i32_4 : i32
    %c20_i32 = arith.constant 20 : i32
    %13 = arith.cmpi slt, %12, %c20_i32 : i32
    %14 = arith.select %13, %11, %5 : vector<8x128xf32>
    %c1_i32 = arith.constant 1 : i32
    %cst_7 = arith.constant dense<0.000000e+00> : vector<8x128xf32>
    %15 = tpu.matmul %14, %3, %cst_7 {dimension_numbers = #tpu.dot_dimension_numbers<[1], [0], [0], [1], [0, 0, 1, 1], [], []>} : vector<8x128xf32>, vector<128x128xf32>, vector<8x128xf32> -> vector<8x128xf32>
    %16 = arith.index_cast %c1_i32 : i32 to index
    %c0_8 = arith.constant 0 : index
    %c0_9 = arith.constant 0 : index
    %17 = vector.load %arg1[%16, %c0_8, %c0_9] : memref<8x8x128xf32, #tpu.memory_space<vmem>>, vector<1x8x128xf32>
    %18 = vector.shape_cast %17 : vector<1x8x128xf32> to vector<8x128xf32>
    %19 = arith.addf %15, %18 : vector<8x128xf32>
    %20 = math.tanh %19 : vector<8x128xf32>
    %21 = arith.addi %4, %c1_i32 : i32
    %c20_i32_10 = arith.constant 20 : i32
    %22 = arith.cmpi slt, %21, %c20_i32_10 : i32
    %23 = arith.select %22, %20, %14 : vector<8x128xf32>
    %c2_i32 = arith.constant 2 : i32
    %cst_11 = arith.constant dense<0.000000e+00> : vector<8x128xf32>
    %24 = tpu.matmul %23, %3, %cst_11 {dimension_numbers = #tpu.dot_dimension_numbers<[1], [0], [0], [1], [0, 0, 1, 1], [], []>} : vector<8x128xf32>, vector<128x128xf32>, vector<8x128xf32> -> vector<8x128xf32>
    %25 = arith.index_cast %c2_i32 : i32 to index
    %c0_12 = arith.constant 0 : index
    %c0_13 = arith.constant 0 : index
    %26 = vector.load %arg1[%25, %c0_12, %c0_13] : memref<8x8x128xf32, #tpu.memory_space<vmem>>, vector<1x8x128xf32>
    %27 = vector.shape_cast %26 : vector<1x8x128xf32> to vector<8x128xf32>
    %28 = arith.addf %24, %27 : vector<8x128xf32>
    %29 = math.tanh %28 : vector<8x128xf32>
    %30 = arith.addi %4, %c2_i32 : i32
    %c20_i32_14 = arith.constant 20 : i32
    %31 = arith.cmpi slt, %30, %c20_i32_14 : i32
    %32 = arith.select %31, %29, %23 : vector<8x128xf32>
    %c3_i32 = arith.constant 3 : i32
    %cst_15 = arith.constant dense<0.000000e+00> : vector<8x128xf32>
    %33 = tpu.matmul %32, %3, %cst_15 {dimension_numbers = #tpu.dot_dimension_numbers<[1], [0], [0], [1], [0, 0, 1, 1], [], []>} : vector<8x128xf32>, vector<128x128xf32>, vector<8x128xf32> -> vector<8x128xf32>
    %34 = arith.index_cast %c3_i32 : i32 to index
    %c0_16 = arith.constant 0 : index
    %c0_17 = arith.constant 0 : index
    %35 = vector.load %arg1[%34, %c0_16, %c0_17] : memref<8x8x128xf32, #tpu.memory_space<vmem>>, vector<1x8x128xf32>
    %36 = vector.shape_cast %35 : vector<1x8x128xf32> to vector<8x128xf32>
    %37 = arith.addf %33, %36 : vector<8x128xf32>
    %38 = math.tanh %37 : vector<8x128xf32>
    %39 = arith.addi %4, %c3_i32 : i32
    %c20_i32_18 = arith.constant 20 : i32
    %40 = arith.cmpi slt, %39, %c20_i32_18 : i32
    %41 = arith.select %40, %38, %32 : vector<8x128xf32>
    %c4_i32 = arith.constant 4 : i32
    %cst_19 = arith.constant dense<0.000000e+00> : vector<8x128xf32>
    %42 = tpu.matmul %41, %3, %cst_19 {dimension_numbers = #tpu.dot_dimension_numbers<[1], [0], [0], [1], [0, 0, 1, 1], [], []>} : vector<8x128xf32>, vector<128x128xf32>, vector<8x128xf32> -> vector<8x128xf32>
    %43 = arith.index_cast %c4_i32 : i32 to index
    %c0_20 = arith.constant 0 : index
    %c0_21 = arith.constant 0 : index
    %44 = vector.load %arg1[%43, %c0_20, %c0_21] : memref<8x8x128xf32, #tpu.memory_space<vmem>>, vector<1x8x128xf32>
    %45 = vector.shape_cast %44 : vector<1x8x128xf32> to vector<8x128xf32>
    %46 = arith.addf %42, %45 : vector<8x128xf32>
    %47 = math.tanh %46 : vector<8x128xf32>
    %48 = arith.addi %4, %c4_i32 : i32
    %c20_i32_22 = arith.constant 20 : i32
    %49 = arith.cmpi slt, %48, %c20_i32_22 : i32
    %50 = arith.select %49, %47, %41 : vector<8x128xf32>
    %c5_i32 = arith.constant 5 : i32
    %cst_23 = arith.constant dense<0.000000e+00> : vector<8x128xf32>
    %51 = tpu.matmul %50, %3, %cst_23 {dimension_numbers = #tpu.dot_dimension_numbers<[1], [0], [0], [1], [0, 0, 1, 1], [], []>} : vector<8x128xf32>, vector<128x128xf32>, vector<8x128xf32> -> vector<8x128xf32>
    %52 = arith.index_cast %c5_i32 : i32 to index
    %c0_24 = arith.constant 0 : index
    %c0_25 = arith.constant 0 : index
    %53 = vector.load %arg1[%52, %c0_24, %c0_25] : memref<8x8x128xf32, #tpu.memory_space<vmem>>, vector<1x8x128xf32>
    %54 = vector.shape_cast %53 : vector<1x8x128xf32> to vector<8x128xf32>
    %55 = arith.addf %51, %54 : vector<8x128xf32>
    %56 = math.tanh %55 : vector<8x128xf32>
    %57 = arith.addi %4, %c5_i32 : i32
    %c20_i32_26 = arith.constant 20 : i32
    %58 = arith.cmpi slt, %57, %c20_i32_26 : i32
    %59 = arith.select %58, %56, %50 : vector<8x128xf32>
    %c6_i32 = arith.constant 6 : i32
    %cst_27 = arith.constant dense<0.000000e+00> : vector<8x128xf32>
    %60 = tpu.matmul %59, %3, %cst_27 {dimension_numbers = #tpu.dot_dimension_numbers<[1], [0], [0], [1], [0, 0, 1, 1], [], []>} : vector<8x128xf32>, vector<128x128xf32>, vector<8x128xf32> -> vector<8x128xf32>
    %61 = arith.index_cast %c6_i32 : i32 to index
    %c0_28 = arith.constant 0 : index
    %c0_29 = arith.constant 0 : index
    %62 = vector.load %arg1[%61, %c0_28, %c0_29] : memref<8x8x128xf32, #tpu.memory_space<vmem>>, vector<1x8x128xf32>
    %63 = vector.shape_cast %62 : vector<1x8x128xf32> to vector<8x128xf32>
    %64 = arith.addf %60, %63 : vector<8x128xf32>
    %65 = math.tanh %64 : vector<8x128xf32>
    %66 = arith.addi %4, %c6_i32 : i32
    %c20_i32_30 = arith.constant 20 : i32
    %67 = arith.cmpi slt, %66, %c20_i32_30 : i32
    %68 = arith.select %67, %65, %59 : vector<8x128xf32>
    %c7_i32 = arith.constant 7 : i32
    %cst_31 = arith.constant dense<0.000000e+00> : vector<8x128xf32>
    %69 = tpu.matmul %68, %3, %cst_31 {dimension_numbers = #tpu.dot_dimension_numbers<[1], [0], [0], [1], [0, 0, 1, 1], [], []>} : vector<8x128xf32>, vector<128x128xf32>, vector<8x128xf32> -> vector<8x128xf32>
    %70 = arith.index_cast %c7_i32 : i32 to index
    %c0_32 = arith.constant 0 : index
    %c0_33 = arith.constant 0 : index
    %71 = vector.load %arg1[%70, %c0_32, %c0_33] : memref<8x8x128xf32, #tpu.memory_space<vmem>>, vector<1x8x128xf32>
    %72 = vector.shape_cast %71 : vector<1x8x128xf32> to vector<8x128xf32>
    %73 = arith.addf %69, %72 : vector<8x128xf32>
    %74 = math.tanh %73 : vector<8x128xf32>
    %75 = arith.addi %4, %c7_i32 : i32
    %c20_i32_34 = arith.constant 20 : i32
    %76 = arith.cmpi slt, %75, %c20_i32_34 : i32
    %77 = arith.select %76, %74, %68 : vector<8x128xf32>
    %c8_i32_35 = arith.constant 8 : i32
    %c0_36 = arith.constant 0 : index
    %c0_37 = arith.constant 0 : index
    %78 = vector.load %arg6[%c0_36, %c0_37] : memref<8x128xf32, #tpu.memory_space<vmem>>, vector<8x128xf32>
    tpu.vector_store %arg6[%c0_36, %c0_37], %77 {strides = array<i32>} : memref<8x128xf32, #tpu.memory_space<vmem>>, vector<8x128xf32>,
    %c2_i32_38 = arith.constant 2 : i32
    %79 = arith.cmpi eq, %arg0, %c2_i32_38 : i32
    %80 = arith.extui %79 : i1 to i32
    %c0_i32_39 = arith.constant 0 : i32
    %81 = arith.cmpi ne, %80, %c0_i32_39 : i32
    scf.if %81 {
      %c0_40 = arith.constant 0 : index
      %c0_41 = arith.constant 0 : index
      %82 = vector.load %arg3[%c0_40, %c0_41] : memref<128x128xf32, #tpu.memory_space<vmem>>, vector<128x128xf32>
      %cst_42 = arith.constant dense<0.000000e+00> : vector<8x128xf32>
      %83 = tpu.matmul %77, %82, %cst_42 {dimension_numbers = #tpu.dot_dimension_numbers<[1], [0], [0], [1], [0, 0, 1, 1], [], []>} : vector<8x128xf32>, vector<128x128xf32>, vector<8x128xf32> -> vector<8x128xf32>
      %c0_43 = arith.constant 0 : index
      %c0_44 = arith.constant 0 : index
      %84 = vector.load %arg4[%c0_43, %c0_44] : memref<1x128xf32, #tpu.memory_space<vmem>>, vector<1x128xf32>
      %85 = vector.broadcast %84 : vector<1x128xf32> to vector<8x128xf32>
      %86 = arith.addf %83, %85 : vector<8x128xf32>
      %c0_45 = arith.constant 0 : index
      %c0_46 = arith.constant 0 : index
      %87 = vector.load %arg5[%c0_45, %c0_46] : memref<8x128xf32, #tpu.memory_space<vmem>>, vector<8x128xf32>
      tpu.vector_store %arg5[%c0_45, %c0_46], %86 {strides = array<i32>} : memref<8x128xf32, #tpu.memory_space<vmem>>, vector<8x128xf32>,
    } else {
    }
    return
  }
  func.func @transform_0(%arg0: i32) -> (i32, i32, i32) {
    %c0_i32 = arith.constant 0 : i32
    %c0_i32_0 = arith.constant 0 : i32
    %c0_i32_1 = arith.constant 0 : i32
    return %arg0, %c0_i32, %c0_i32_0 : i32, i32, i32
  }
  func.func @transform_1(%arg0: i32) -> (i32, i32) {
    %c0_i32 = arith.constant 0 : i32
    %c0_i32_0 = arith.constant 0 : i32
    %c0_i32_1 = arith.constant 0 : i32
    return %c0_i32, %c0_i32_0 : i32, i32
  }
  func.func @transform_2(%arg0: i32) -> (i32, i32) {
    %c0_i32 = arith.constant 0 : i32
    %c0_i32_0 = arith.constant 0 : i32
    %c0_i32_1 = arith.constant 0 : i32
    return %c0_i32, %c0_i32_0 : i32, i32
  }
  func.func @transform_3(%arg0: i32) -> (i32, i32) {
    %c0_i32 = arith.constant 0 : i32
    %c0_i32_0 = arith.constant 0 : i32
    %c0_i32_1 = arith.constant 0 : i32
    return %c0_i32, %c0_i32_0 : i32, i32
  }
  func.func @transform_4(%arg0: i32) -> (i32, i32) {
    %c0_i32 = arith.constant 0 : i32
    %c0_i32_0 = arith.constant 0 : i32
    %c0_i32_1 = arith.constant 0 : i32
    return %c0_i32, %c0_i32_0 : i32, i32
  }
}

</mosaic_0001>

<bundles_post_ra>
// kernel: tpu_custom_call.1
= control target key start
LH: loop header
LB: loop body
LE: loop exit
PB: predicated region body
PF: predicated region fallthrough
CT: control target
= control target key end

     0   :  { %9 = vsyncpa [#allocation4], 0  ;;  %s2450_s0 = inlined_call_operand.hbm [shape: f32[24,8,128], index: 0, kind: input, shape index: {}]   ;;  %s2451_s1 = inlined_call_operand.hbm [shape: f32[128,128], index: 1, kind: input, shape index: {}]   ;;  %s2452_s2 = inlined_call_operand.hbm [shape: f32[128,128], index: 2, kind: input, shape index: {}]   ;;  %s2453_s3 = inlined_call_operand.vmem [shape: f32[1,128], index: 3, kind: input, shape index: {}]   ;;  %s2454_s4 = inlined_call_operand.hbm [shape: f32[8,128], index: 4, kind: output, shape index: {}]  }
   0x1   :  { %11 = vsyncpa [#allocation4 + $0x1], 0 }
   0x2   :  { %12 = vsyncpa [#allocation7], 0 }
   0x3   :  { %13 = vsyncpa [#allocation5], 0  ;;  %s2060_s15 = smov 0   ;;  %s2062_s16 = smov 0  }
   0x4   :  { %s2064_s17 = smov 0   ;;  %s2066_s18 = smov 0  }
   0x5 LB: > { %s2079_s19 = sadd.s32 4294967295, %s2020_s18   ;;  %p39_p0 = scmp.ne.s32.totalorder %s2012_s16, %s2008_s15  ;;  %s2020_s18 = sphi %s2066_s18, %s2470_s18   ;;  %s2016_s17 = sphi %s2064_s17, %s2469_s17   ;;  %s2012_s16 = sphi %s2062_s16, %s2468_s16   ;;  %s2008_s15 = sphi %s2060_s15, %s2467_s15  }
   0x6   : > { %p2455_p1 = scmp.eq.s32.totalorder %s2079_s19, 0  ;;  %p1063_p2 = scmp.ge.s32.totalorder %s2020_s18, 1 }
   0x7   : > { %p134_p3 = scmp.lt.s32.totalorder %s2020_s18, 4  ;;  %s2022_s22 = smov [#allocation6]  }
   0x8   : > { %p2088_p5 = por %p2455_p1, %p39_p0  ;;  %s146_s23 = sshll.u32 %s2022_s22, 4  ;;  %s147_s23 = int_to_ptr.vmem [resolvable:$true] %s146_s23 }
   0x9   : > { %p2092_p6 = pnand %p1063_p2, %p134_p3  ;;  %s2023_s25 = smov [#allocation8]  }
   0xa   : > { %s2458_s20 = scalar_select %p2088_p5, 1, 0 }
   0xb   : > { %s2459_s21 = scalar_select %p2092_p6, 1, 0 }
   0xc   : > { %p1788_p7 = pneg %p2092_p6  ;;  %s159_s26 = sshll.u32 %s2023_s25, 4  ;;  %s2104_s26 = int_to_ptr.vmem [resolvable:$true] %s159_s26 }
   0xd   : > { %s1866_s29 = scalar_lea.hbm %s2451_s1, 2048 }
   0xe   : > { %p2100_p8 = pnand %p1788_p7, %p2455_p1  ;;  %p1867_p9 = scmp.ne.s32.totalorder %s2451_s1, %s1866_s29 }
   0xf   : > { %p1873_p13 = scmp.lt.u32.totalorder %s1866_s29, %s2451_s1 }
  0x10   : > { %p1868_p10 = pneg %p2100_p8 }
  0x12   : > { %p1869_p11 = pnand %p1868_p10, %p1867_p9 }
  0x14   : > { %p1870_p12 = pneg %p1869_p11 }
  0x16   : > { %p1875_p0 = pnand %p1873_p13, %p1870_p12 }
  0x18   : > { %1878 = shalt.err (!%p1875_p0)
}
  0x19   : > { %s1879_s8 = scalar_lea.vmem %s147_s23, 2048  ;;  %p1887_p4 = scmp.lt.s32.totalorder %s147_s23, %s147_s23 }
  0x1a   : > { %p1880_p2 = scmp.ne.s32.totalorder %s147_s23, %s1879_s8  ;;  %p1888_p1 = scmp.lt.s32.totalorder %s1879_s8, %s1879_s8 }
  0x1c   : > { %p1882_p3 = pnand %p1880_p2, %p1868_p10  ;;  %p1889_p5 = por %p1888_p1, %p1887_p4 }
  0x1e   : > { %p1883_p7 = pneg %p1882_p3 }
  0x20   : > { %p1890_p6 = pnand %p1889_p5, %p1883_p7 }
  0x22   : > { %1893 = shalt.err (!%p1890_p6)
}
  0x23   : > { %s2024_s9 = smov 128   ;;  %s2025_s10 = smov 8  }
  0x24   : > { %1791 = dma.hbm_to_vmem [thread:$0]  (!%p2100_p8), %s2451_s1, 2048, %s147_s23, [#allocation7], %s2024_s9, %s2024_s9, %s2025_s10  }
  0x25   : > { %s1894_s15 = scalar_lea.hbm %s2452_s2, 2048 }
  0x26   : > { %p1895_p1 = scmp.ne.s32.totalorder %s2452_s2, %s1894_s15  ;;  %p1901_p6 = scmp.lt.u32.totalorder %s1894_s15, %s2452_s2 }
  0x28   : > { %p1897_p4 = pnand %p1895_p1, %p1868_p10 }
  0x2a   : > { %p1898_p5 = pneg %p1897_p4 }
  0x2c   : > { %p1903_p9 = pnand %p1901_p6, %p1898_p5 }
  0x2e   : > { %1906 = shalt.err (!%p1903_p9)
}
  0x2f   : > { %s1907_s23 = scalar_lea.vmem %s2104_s26, 2048  ;;  %p1915_p0 = scmp.lt.s32.totalorder %s2104_s26, %s2104_s26 }
  0x30   : > { %p1908_p11 = scmp.ne.s32.totalorder %s2104_s26, %s1907_s23  ;;  %p1916_p2 = scmp.lt.s32.totalorder %s1907_s23, %s1907_s23 }
  0x32   : > { %p1910_p12 = pnand %p1908_p11, %p1868_p10  ;;  %p1917_p3 = por %p1916_p2, %p1915_p0 }
  0x34   : > { %p1911_p13 = pneg %p1910_p12 }
  0x36   : > { %p1918_p7 = pnand %p1917_p3, %p1911_p13 }
  0x38   : > { %1921 = shalt.err (!%p1918_p7)
}
  0x39   : > { %1794 = dma.hbm_to_vmem [thread:$0]  (!%p2100_p8), %s2452_s2, 2048, %s2104_s26, [#allocation7], %s2024_s9, %s2024_s9, %s2025_s10  }
  0x3a   : > { %s2160_s5 = sadd.s32 1, %s2020_s18   ;;  %s26_s24 = sadd.s32 1, %s2016_s17 }
  0x3b   : > { %s23_s6 = ssub.s32 %s2020_s18, %s2160_s5  ;;  %p33_p10 = scmp.ne.s32.totalorder %s2016_s17, %s2012_s16 }
  0x3c   : > { %p24_p1 = scmp.eq.s32.totalorder %s23_s6, 0  ;;  %p34_p4 = scmp.eq.s32.totalorder %s2020_s18, 0 }
  0x3d   : > { %p1801_p5 = scmp.lt.s32.totalorder %s2020_s18, 3  ;;  %s176_s7 = sand.u32 1, %s2016_s17  }
  0x3e   : > { %s2171_s8 = scalar_select %p24_p1, %s2016_s17, %s26_s24  }
  0x3f   : > { %p35_p6 = por %p34_p4, %p33_p10  ;;  %s1067_s11 = sshll.u32 %s176_s7, 6 }
  0x40   : > { %s1089_s12 = sshll.u32 %s2020_s18, 10  ;;  %s180_s26 = scalar_lea.vmem [#allocation3], %s1067_s11 }
  0x41   : > { %s2177_s15 = scalar_lea.hbm %s2450_s0, %s1089_s12  ;;  %s187_s22 = sshll.u32 %s180_s26, 4  ;;  %s2183_s22 = int_to_ptr.vmem [resolvable:$true] %s187_s22 }
  0x42   : > { %p2179_p8 = pnand %p1801_p5, %p35_p6  ;;  %s2185_s18 = scalar_lea.sflag [#allocation4], %s176_s7 }
  0x43   : > { %s1922_s27 = scalar_lea.hbm %s2177_s15, 1024  ;;  %s1927_s29 = scalar_lea.hbm %s2450_s0, 3072 }
  0x44   : > { %p1923_p9 = scmp.ne.s32.totalorder %s2177_s15, %s1922_s27  ;;  %p1924_p11 = pneg %p2179_p8 }
  0x45   : > { %p1928_p0 = scmp.lt.u32.totalorder %s2177_s15, %s2450_s0  ;;  %p1929_p2 = scmp.lt.u32.totalorder %s1927_s29, %s1922_s27 }
  0x46   : > { %p1925_p12 = pnand %p1924_p11, %p1923_p9  ;;  %p1931_p7 = scmp.lt.u32.totalorder %s1922_s27, %s2177_s15 }
  0x47   : > { %p1930_p3 = por %p1929_p2, %p1928_p0 }
  0x48   : > { %p1926_p13 = pneg %p1925_p12 }
  0x49   : > { %p1932_p10 = por %p1931_p7, %p1930_p3 }
  0x4b   : > { %p1933_p1 = pnand %p1932_p10, %p1926_p13 }
  0x4d   : > { %1936 = shalt.err (!%p1933_p1)
}
  0x4e   : > { %s1937_s6 = scalar_lea.vmem %s2183_s22, 1024  ;;  %s2026_s7 = smov [#allocation3]  }
  0x4f   : > { %p1938_p4 = scmp.ne.s32.totalorder %s2183_s22, %s1937_s6  ;;  %s1942_s11 = sshll.u32 %s2026_s7, 4  ;;  %s1943_s11 = int_to_ptr.vmem [resolvable:$false] %s1942_s11 }
  0x50   : > { %s1944_s12 = scalar_lea.vmem %s1943_s11, 2048  ;;  %p1945_p9 = scmp.lt.s32.totalorder %s2183_s22, %s1943_s11 }
  0x51   : > { %p1940_p5 = pnand %p1938_p4, %p1924_p11  ;;  %p1946_p12 = scmp.lt.s32.totalorder %s1944_s12, %s1937_s6 }
  0x53   : > { %p1941_p6 = pneg %p1940_p5  ;;  %p1947_p0 = por %p1946_p12, %p1945_p9 }
  0x55   : > { %p1948_p2 = pnand %p1947_p0, %p1941_p6 }
  0x57   : > { %1951 = shalt.err (!%p1948_p2)
}
  0x58   : > { %1798 = dma.hbm_to_vmem [thread:$0]  (!%p2179_p8), %s2177_s15, 1024, %s2183_s22, %s2185_s18, %s2024_s9, %s2024_s9, %s2025_s10  }
  0x59   : > { %p2462_p11 = scmp.ne.s32.totalorder %s2459_s21, 0 }
  0x5a   : > { %s201_s13 = sand.u32 (!%p2462_p11), 1, %s2012_s16   ;;  %p2463_p13 = scmp.ne.s32.totalorder (!%p2462_p11), %s2458_s20, 0 }
  0x5b   : > { %199 = sbr.rel (%p2462_p11) target bundleno = 2193 (0x891), region = 36  ;;  %s1071_s14 = sshll.u32 (!%p2462_p11), %s201_s13, 6 }
  0x5c   : > { %s202_s26 = scalar_lea.sflag (!%p2462_p11), [#allocation4], %s201_s13  ;;  %s2219_s27 = scalar_lea.vmem (!%p2462_p11), [#allocation3], %s1071_s14 }
  0x62   : > { %1995 = dma.done.wait (%p2463_p13), %s202_s26, 1024  }
  0x63   : > { %1997 = vsyncadd (%p2463_p13), %s202_s26, 4294966272  ;;  %p2464_p3 = scmp.eq.s32.totalorder %s2079_s19, 0 }
  0x65   : > { %1999 = dma.done.wait (%p2464_p3), [#allocation7], 4096   ;;  %p2465_p8 = pmov %p2464_p3 }
  0x66   : > { %p2466_p7 = scmp.ne.s32.totalorder %s2079_s19, 0 }
  0x67   : > { %2001 = vsyncadd (%p2465_p8), [#allocation7], 4294963200  ;;  %v2027_v0 = vmov (!%p2466_p7), 0.0  }
  0x68   : > { %237 = sbr.rel (%p2466_p7) target bundleno = 111 (0x6f), region = 52  ;;  %238 = vst [vmem:[#allocation2] sm:$0xff] (!%p2466_p7), %v2027_v0 }
  0x6f PF: > { %v239_v1 = vld [vmem:[#allocation6] sm:$0xff]  ;;  %v240_v2 = vld [vmem:[#allocation6 + $0x8] sm:$0xff]  ;;  %v241_v3 = vld [vmem:[#allocation6 + $0x10] sm:$0xff]  ;;  %v2028_v4 = vmov 0.0|0.0   ;;  %vm2029_vm0 = vmmov 0   ;;  %v2030_v7 = vmov 0.0  }
  0x70   : > { %1558 = vmatprep.subr.bf16.mxu0 %v2028_v4  ;;  %v2232_v5 = vpack.c.bf16 %v240_v2, %v239_v1  ;;  %v242_v6 = vld [vmem:[#allocation6 + $0x18] sm:$0xff]  ;;  %1275 = vmatprep.mubr.msk.f32.mxu0 %vm2029_vm0, %v2030_v7  ;;  %v243_v9 = vld [vmem:[#allocation6 + $0x20] sm:$0xff]  ;;  %v244_v10 = vld [vmem:[#allocation6 + $0x28] sm:$0xff]  ;;  %s2304_s20 = sshll.u32 %s2079_s19, 3  ;;  %p1083_p2 = scmp.ne.s32.totalorder %s2079_s19, 2 }
  0x71   : > { %1582 = vmatprep.subr.bf16.mxu1 %v2028_v4  ;;  %1310 = vmatprep.mubr.msk.f32.mxu1 %vm2029_vm0, %v2030_v7  ;;  %v2240_v8 = vpack.c.bf16 %v242_v6, %v241_v3  ;;  %v2246_v11 = vpack.c.bf16 %v244_v10, %v243_v9  ;;  %v245_v12 = vld [vmem:[#allocation6 + $0x30] sm:$0xff]  ;;  %v246_v13 = vld [vmem:[#allocation6 + $0x38] sm:$0xff]  ;;  %v247_v15 = vld [vmem:[#allocation6 + $0x40] sm:$0xff]  ;;  %p329_p10 = scmp.lt.s32.totalorder %s2304_s20, 20  ;;  %s407_s9 = sadd.s32 1, %s2304_s20  ;;  %vm2032_vm9 = vmmov (!%p1083_p2), 0  }
  0x72   : > { %1560 = vmatpush3.bf16.msra.mxu0 %v2232_v5  ;;  %1584 = vmatpush3.bf16.msra.mxu1 %v2232_v5  ;;  %v2252_v14 = vpack.c.bf16 %v246_v13, %v245_v12  ;;  %v248_v16 = vld [vmem:[#allocation6 + $0x48] sm:$0xff]  ;;  %v249_v18 = vld [vmem:[#allocation6 + $0x50] sm:$0xff]  ;;  %v250_v19 = vld [vmem:[#allocation6 + $0x58] sm:$0xff]  ;;  %p408_p1 = scmp.lt.s32.totalorder %s407_s9, 20  ;;  %s486_s15 = sadd.s32 2, %s2304_s20 }
  0x73   : > { %1561 = vmatprep.subr.bf16.mxu0 %v2028_v4  ;;  %1585 = vmatprep.subr.bf16.mxu1 %v2028_v4  ;;  %v2258_v17 = vpack.c.bf16 %v248_v16, %v247_v15  ;;  %v2264_v20 = vpack.c.bf16 %v250_v19, %v249_v18  ;;  %v251_v21 = vld [vmem:[#allocation6 + $0x60] sm:$0xff]  ;;  %v252_v22 = vld [vmem:[#allocation6 + $0x68] sm:$0xff]  ;;  %v253_v24 = vld [vmem:[#allocation6 + $0x70] sm:$0xff]  ;;  %s330_s21 = scalar_select %p329_p10, 1, 0 }
  0x74   : > { %v2270_v23 = vpack.c.bf16 %v252_v22, %v251_v21  ;;  %v254_v25 = vld [vmem:[#allocation6 + $0x78] sm:$0xff]  ;;  %v257_v28 = vld [vmem:[%s2219_s27] sm:$0xff]  ;;  %v1076_v35 = vld [vmem:[%s2219_s27 + $0x8] sm:$0xff]  ;;  %s409_s10 = scalar_select %p408_p1, 1, 0 }
  0x75   : > { %v2276_v26 = vpack.c.bf16 %v254_v25, %v253_v24  ;;  %v256_v27 = vld [vmem:[#allocation2] sm:$0xff]  ;;  %v331_v32 = vstv %s330_s21  ;;  %v1077_v42 = vld [vmem:[%s2219_s27 + $0x10] sm:$0xff]  ;;  %p487_p4 = scmp.lt.s32.totalorder %s486_s15, 20  ;;  %s565_s25 = sadd.s32 3, %s2304_s20  ;;  %v1079_v56 = vld [vmem:[%s2219_s27 + $0x20] sm:$0xff] }
  0x76   : > { %1563 = vmatpush3.bf16.msra.mxu0 %v2240_v8  ;;  %1587 = vmatpush3.bf16.msra.mxu1 %v2240_v8  ;;  %vm332_vm1 = vcmp.eq.s32.totalorder %v331_v32, 1  ;;  %v410_v39 = vstv %s409_s10  ;;  %v1078_v49 = vld [vmem:[%s2219_s27 + $0x18] sm:$0xff]  ;;  %p566_p5 = scmp.lt.s32.totalorder %s565_s25, 20  ;;  %s644_s28 = sadd.s32 4, %s2304_s20  ;;  %v1080_v63 = vld [vmem:[%s2219_s27 + $0x28] sm:$0xff]  ;;  %v894_v22 = vld [vmem:[#allocation8 + $0x10] sm:$0xff] (!%p1083_p2) }
  0x77   : > { %1564 = vmatprep.subr.bf16.mxu0 %v2028_v4  ;;  %1588 = vmatprep.subr.bf16.mxu1 %v2028_v4  ;;  %vm411_vm2 = vcmp.eq.s32.totalorder %v410_v39, 1  ;;  %s488_s22 = scalar_select %p487_p4, 1, 0  ;;  %v1082_v13 = vld [vmem:[%s2219_s27 + $0x38] sm:$0xff] }
  0x78   : > { %s567_s18 = scalar_select %p566_p5, 1, 0 }
  0x79   : > { %v489_v46 = vstv %s488_s22  ;;  %p645_p6 = scmp.lt.s32.totalorder %s644_s28, 20  ;;  %s723_s29 = sadd.s32 5, %s2304_s20  ;;  %v893_v21 = vld [vmem:[#allocation8 + $0x8] sm:$0xff] (!%p1083_p2)  ;;  %v895_v25 = vld [vmem:[#allocation8 + $0x18] sm:$0xff] (!%p1083_p2) }
  0x7a   : > { %1566 = vmatpush3.bf16.msra.mxu0 %v2246_v11  ;;  %1590 = vmatpush3.bf16.msra.mxu1 %v2246_v11  ;;  %vm490_vm3 = vcmp.eq.s32.totalorder %v489_v46, 1  ;;  %v568_v53 = vstv %s567_s18  ;;  %p724_p9 = scmp.lt.s32.totalorder %s723_s29, 20  ;;  %s802_s24 = sadd.s32 6, %s2304_s20  ;;  %v899_v32 = vld [vmem:[#allocation8 + $0x38] sm:$0xff] (!%p1083_p2) }
  0x7b   : > { %1567 = vmatprep.subr.bf16.mxu0 %v2028_v4  ;;  %1591 = vmatprep.subr.bf16.mxu1 %v2028_v4  ;;  %vm569_vm4 = vcmp.eq.s32.totalorder %v568_v53, 1  ;;  %s646_s23 = scalar_select %p645_p6, 1, 0 }
  0x7c   : > { %s725_s30 = scalar_select %p724_p9, 1, 0 }
  0x7d   : > { %v647_v60 = vstv %s646_s23  ;;  %p803_p12 = scmp.lt.s32.totalorder %s802_s24, 20  ;;  %s881_s7 = sadd.s32 7, %s2304_s20  ;;  %v1084_v46 = vld [vmem:[%s2453_s3] ss:$0 sm:$0xff] (!%p1083_p2) }
  0x7e   : > { %1569 = vmatpush3.bf16.msra.mxu0 %v2252_v14  ;;  %1593 = vmatpush3.bf16.msra.mxu1 %v2252_v14  ;;  %vm648_vm5 = vcmp.eq.s32.totalorder %v647_v60, 1  ;;  %v726_v3 = vstv %s725_s30  ;;  %p882_p0 = scmp.lt.s32.totalorder %s881_s7, 20 }
  0x7f   : > { %1570 = vmatprep.subr.bf16.mxu0 %v2028_v4  ;;  %1594 = vmatprep.subr.bf16.mxu1 %v2028_v4  ;;  %vm727_vm6 = vcmp.eq.s32.totalorder %v726_v3, 1  ;;  %s804_s6 = scalar_select %p803_p12, 1, 0 }
  0x80   : > { %s883_s11 = scalar_select %p882_p0, 1, 0 }
  0x81   : > { %v805_v10 = vstv %s804_s6 }
  0x82   : > { %1572 = vmatpush3.bf16.msra.mxu0 %v2258_v17  ;;  %1596 = vmatpush3.bf16.msra.mxu1 %v2258_v17  ;;  %vm806_vm7 = vcmp.eq.s32.totalorder %v805_v10, 1 }
  0x83   : > { %1573 = vmatprep.subr.bf16.mxu0 %v2028_v4  ;;  %1597 = vmatprep.subr.bf16.mxu1 %v2028_v4 }
  0x86   : > { %1575 = vmatpush3.bf16.msra.mxu0 %v2264_v20  ;;  %1599 = vmatpush3.bf16.msra.mxu1 %v2264_v20 }
  0x87   : > { %1576 = vmatprep.subr.bf16.mxu0 %v2028_v4  ;;  %1600 = vmatprep.subr.bf16.mxu1 %v2028_v4 }
  0x8a   : > { %1578 = vmatpush3.bf16.msra.mxu0 %v2270_v23  ;;  %1602 = vmatpush3.bf16.msra.mxu1 %v2270_v23 }
  0x8b   : > { %1579 = vmatprep.subr.bf16.mxu0 %v2028_v4  ;;  %1603 = vmatprep.subr.bf16.mxu1 %v2028_v4 }
  0x8e   : > { %1581 = vmatpush3.bf16.msra.mxu0 %v2276_v26  ;;  %1605 = vmatpush3.bf16.msra.mxu1 %v2276_v26 }
  0x8f   : > { %1606 = vmatprep.subr.bf16.mxu0 %v2028_v4  ;;  %1630 = vmatprep.subr.bf16.mxu1 %v2028_v4 }
  0x91   : > { %1276 = vmatmul.mubr.f32.vlgmr.msra.gmra.mrb[0].mxu0 %v256_v27 }
  0x92   : > { %1608 = vmatpush3.bf16.msra.mxu0 %v2232_v5  ;;  %1345 = vmatprep.mubr.msk.f32.mxu0 %vm2029_vm0, %v2030_v7 }
  0x93   : > { %1609 = vmatprep.subr.bf16.mxu0 %v2028_v4 }
  0x96   : > { %1611 = vmatpush3.bf16.msra.mxu0 %v2240_v8 }
  0x97   : > { %1612 = vmatprep.subr.bf16.mxu0 %v2028_v4 }
  0x9a   : > { %1614 = vmatpush3.bf16.msra.mxu0 %v2246_v11 }
  0x9b   : > { %1615 = vmatprep.subr.bf16.mxu0 %v2028_v4 }
  0x9e   : > { %1617 = vmatpush3.bf16.msra.mxu0 %v2252_v14 }
  0x9f   : > { %1618 = vmatprep.subr.bf16.mxu0 %v2028_v4 }
  0xa2   : > { %1620 = vmatpush3.bf16.msra.mxu0 %v2258_v17 }
  0xa3   : > { %1621 = vmatprep.subr.bf16.mxu0 %v2028_v4 }
  0xa6   : > { %1623 = vmatpush3.bf16.msra.mxu0 %v2264_v20 }
  0xa7   : > { %1624 = vmatprep.subr.bf16.mxu0 %v2028_v4 }
  0xaa   : > { %1626 = vmatpush3.bf16.msra.mxu0 %v2270_v23 }
  0xab   : > { %1627 = vmatprep.subr.bf16.mxu0 %v2028_v4 }
  0xae   : > { %1629 = vmatpush3.bf16.msra.mxu0 %v2276_v26 }
  0xaf   : > { %1654 = vmatprep.subr.bf16.mxu0 %v2028_v4 }
 0x164   : > { %v324_v29 = vpop.f32.mrb[0].mxu0 }
 0x165   : > { %v325_v30 = vadd.f32 %v324_v29, %v257_v28  ;;  %v1277_v31 = vpop.f32.mrb[1].mxu0  ;;  %v896_v28 = vld [vmem:[#allocation8 + $0x20] sm:$0xff] (!%p1083_p2)  ;;  %v897_v29 = vld [vmem:[#allocation8 + $0x28] sm:$0xff] (!%p1083_p2) }
 0x166   : > { %v898_v31 = vld [vmem:[#allocation8 + $0x30] sm:$0xff] (!%p1083_p2) }
 0x167   : > { %1850 = vtanh.f32 %v325_v30  ;;  %v1757_v30 = vpack.c.bf16 (!%p1083_p2), %v897_v29, %v896_v28 }
 0x171   : > { %v1851_v33 = vpop.eup %1850 }
 0x172   : > { %v333_v34 = vsel %vm332_vm1, %v1851_v33, %v256_v27  ;;  %v1754_v27 = vpack.c.bf16 (!%p1083_p2), %v895_v25, %v894_v22  ;;  %v1760_v33 = vpack.c.bf16 (!%p1083_p2), %v899_v32, %v898_v31 }
 0x173   : > { %1311 = vmatmul.mubr.f32.vlgmr.msra.gmra.mrb[0].mxu1 %v333_v34 }
 0x174   : > { %1632 = vmatpush3.bf16.msra.mxu1 %v2232_v5  ;;  %1380 = vmatprep.mubr.msk.f32.mxu1 %vm2029_vm0, %v2030_v7 }
 0x175   : > { %1633 = vmatprep.subr.bf16.mxu1 %v2028_v4 }
 0x178   : > { %1635 = vmatpush3.bf16.msra.mxu1 %v2240_v8 }
 0x179   : > { %1636 = vmatprep.subr.bf16.mxu1 %v2028_v4 }
 0x17c   : > { %1638 = vmatpush3.bf16.msra.mxu1 %v2246_v11 }
 0x17d   : > { %1639 = vmatprep.subr.bf16.mxu1 %v2028_v4 }
 0x180   : > { %1641 = vmatpush3.bf16.msra.mxu1 %v2252_v14 }
 0x181   : > { %1642 = vmatprep.subr.bf16.mxu1 %v2028_v4 }
 0x184   : > { %1644 = vmatpush3.bf16.msra.mxu1 %v2258_v17 }
 0x185   : > { %1645 = vmatprep.subr.bf16.mxu1 %v2028_v4 }
 0x188   : > { %1647 = vmatpush3.bf16.msra.mxu1 %v2264_v20 }
 0x189   : > { %1648 = vmatprep.subr.bf16.mxu1 %v2028_v4 }
 0x18c   : > { %1650 = vmatpush3.bf16.msra.mxu1 %v2270_v23 }
 0x18d   : > { %1651 = vmatprep.subr.bf16.mxu1 %v2028_v4 }
 0x190   : > { %1653 = vmatpush3.bf16.msra.mxu1 %v2276_v26 }
 0x191   : > { %1678 = vmatprep.subr.bf16.mxu1 %v2028_v4 }
 0x246   : > { %v402_v36 = vpop.f32.mrb[0].mxu1 }
 0x247   : > { %v403_v37 = vadd.f32 %v1076_v35, %v402_v36  ;;  %v1312_v38 = vpop.f32.mrb[1].mxu1  ;;  %v901_v35 = vld [vmem:[#allocation8 + $0x48] sm:$0xff] (!%p1083_p2) }
 0x248   : > { %v903_v38 = vld [vmem:[#allocation8 + $0x58] sm:$0xff] (!%p1083_p2) }
 0x249   : > { %1852 = vtanh.f32 %v403_v37  ;;  %v902_v37 = vld [vmem:[#allocation8 + $0x50] sm:$0xff] (!%p1083_p2) }
 0x24a   : > { %v1766_v39 = vpack.c.bf16 (!%p1083_p2), %v903_v38, %v902_v37 }
 0x253   : > { %v1853_v40 = vpop.eup %1852 }
 0x254   : > { %v412_v41 = vsel %vm411_vm2, %v1853_v40, %v333_v34  ;;  %v900_v34 = vld [vmem:[#allocation8 + $0x40] sm:$0xff] (!%p1083_p2) }
 0x255   : > { %1346 = vmatmul.mubr.f32.vlgmr.msra.gmra.mrb[2].mxu0 %v412_v41  ;;  %v1763_v36 = vpack.c.bf16 (!%p1083_p2), %v901_v35, %v900_v34  ;;  %v904_v40 = vld [vmem:[#allocation8 + $0x60] sm:$0xff] (!%p1083_p2) }
 0x256   : > { %1656 = vmatpush3.bf16.msra.mxu0 %v2232_v5  ;;  %1415 = vmatprep.mubr.msk.f32.mxu0 %vm2029_vm0, %v2030_v7 }
 0x257   : > { %1657 = vmatprep.subr.bf16.mxu0 %v2028_v4 }
 0x25a   : > { %1659 = vmatpush3.bf16.msra.mxu0 %v2240_v8 }
 0x25b   : > { %1660 = vmatprep.subr.bf16.mxu0 %v2028_v4 }
 0x25e   : > { %1662 = vmatpush3.bf16.msra.mxu0 %v2246_v11 }
 0x25f   : > { %1663 = vmatprep.subr.bf16.mxu0 %v2028_v4 }
 0x262   : > { %1665 = vmatpush3.bf16.msra.mxu0 %v2252_v14 }
 0x263   : > { %1666 = vmatprep.subr.bf16.mxu0 %v2028_v4 }
 0x266   : > { %1668 = vmatpush3.bf16.msra.mxu0 %v2258_v17 }
 0x267   : > { %1669 = vmatprep.subr.bf16.mxu0 %v2028_v4 }
 0x26a   : > { %1671 = vmatpush3.bf16.msra.mxu0 %v2264_v20 }
 0x26b   : > { %1672 = vmatprep.subr.bf16.mxu0 %v2028_v4 }
 0x26e   : > { %1674 = vmatpush3.bf16.msra.mxu0 %v2270_v23 }
 0x26f   : > { %1675 = vmatprep.subr.bf16.mxu0 %v2028_v4 }
 0x272   : > { %1677 = vmatpush3.bf16.msra.mxu0 %v2276_v26 }
 0x273   : > { %1702 = vmatprep.subr.bf16.mxu0 %v2028_v4 }
 0x328   : > { %v481_v43 = vpop.f32.mrb[2].mxu0 }
 0x329   : > { %v482_v44 = vadd.f32 %v1077_v42, %v481_v43  ;;  %v1347_v45 = vpop.f32.mrb[3].mxu0  ;;  %v906_v43 = vld [vmem:[#allocation8 + $0x70] sm:$0xff] (!%p1083_p2) }
 0x32b   : > { %1854 = vtanh.f32 %v482_v44  ;;  %v907_v44 = vld [vmem:[#allocation8 + $0x78] sm:$0xff] (!%p1083_p2) }
 0x32c   : > { %v1772_v45 = vpack.c.bf16 (!%p1083_p2), %v907_v44, %v906_v43 }
 0x335   : > { %v1855_v47 = vpop.eup %1854 }
 0x336   : > { %v491_v48 = vsel %vm490_vm3, %v1855_v47, %v412_v41  ;;  %v905_v41 = vld [vmem:[#allocation8 + $0x68] sm:$0xff] (!%p1083_p2) }
 0x337   : > { %1381 = vmatmul.mubr.f32.vlgmr.msra.gmra.mrb[2].mxu1 %v491_v48  ;;  %v1769_v42 = vpack.c.bf16 (!%p1083_p2), %v905_v41, %v904_v40 }
 0x338   : > { %1680 = vmatpush3.bf16.msra.mxu1 %v2232_v5  ;;  %1450 = vmatprep.mubr.msk.f32.mxu1 %vm2029_vm0, %v2030_v7 }
 0x339   : > { %1681 = vmatprep.subr.bf16.mxu1 %v2028_v4 }
 0x33c   : > { %1683 = vmatpush3.bf16.msra.mxu1 %v2240_v8 }
 0x33d   : > { %1684 = vmatprep.subr.bf16.mxu1 %v2028_v4 }
 0x340   : > { %1686 = vmatpush3.bf16.msra.mxu1 %v2246_v11 }
 0x341   : > { %1687 = vmatprep.subr.bf16.mxu1 %v2028_v4 }
 0x344   : > { %1689 = vmatpush3.bf16.msra.mxu1 %v2252_v14 }
 0x345   : > { %1690 = vmatprep.subr.bf16.mxu1 %v2028_v4 }
 0x348   : > { %1692 = vmatpush3.bf16.msra.mxu1 %v2258_v17 }
 0x349   : > { %1693 = vmatprep.subr.bf16.mxu1 %v2028_v4 }
 0x34c   : > { %1695 = vmatpush3.bf16.msra.mxu1 %v2264_v20 }
 0x34d   : > { %1696 = vmatprep.subr.bf16.mxu1 %v2028_v4 }
 0x350   : > { %1698 = vmatpush3.bf16.msra.mxu1 %v2270_v23 }
 0x351   : > { %1699 = vmatprep.subr.bf16.mxu1 %v2028_v4 }
 0x354   : > { %1701 = vmatpush3.bf16.msra.mxu1 %v2276_v26 }
 0x355   : > { %1726 = vmatprep.subr.bf16.mxu1 %v2028_v4 }
 0x40a   : > { %v560_v50 = vpop.f32.mrb[2].mxu1 }
 0x40b   : > { %v561_v51 = vadd.f32 %v1078_v49, %v560_v50  ;;  %v1382_v52 = vpop.f32.mrb[3].mxu1 }
 0x40d   : > { %1856 = vtanh.f32 %v561_v51 }
 0x417   : > { %v1857_v54 = vpop.eup %1856 }
 0x418   : > { %v570_v55 = vsel %vm569_vm4, %v1857_v54, %v491_v48 }
 0x419   : > { %1416 = vmatmul.mubr.f32.vlgmr.msra.gmra.mrb[4].mxu0 %v570_v55 }
 0x41a   : > { %1704 = vmatpush3.bf16.msra.mxu0 %v2232_v5  ;;  %1485 = vmatprep.mubr.msk.f32.mxu0 %vm2029_vm0, %v2030_v7 }
 0x41b   : > { %1705 = vmatprep.subr.bf16.mxu0 %v2028_v4 }
 0x41e   : > { %1707 = vmatpush3.bf16.msra.mxu0 %v2240_v8 }
 0x41f   : > { %1708 = vmatprep.subr.bf16.mxu0 %v2028_v4 }
 0x422   : > { %1710 = vmatpush3.bf16.msra.mxu0 %v2246_v11 }
 0x423   : > { %1711 = vmatprep.subr.bf16.mxu0 %v2028_v4 }
 0x426   : > { %1713 = vmatpush3.bf16.msra.mxu0 %v2252_v14 }
 0x427   : > { %1714 = vmatprep.subr.bf16.mxu0 %v2028_v4 }
 0x42a   : > { %1716 = vmatpush3.bf16.msra.mxu0 %v2258_v17 }
 0x42b   : > { %1717 = vmatprep.subr.bf16.mxu0 %v2028_v4 }
 0x42e   : > { %1719 = vmatpush3.bf16.msra.mxu0 %v2264_v20 }
 0x42f   : > { %1720 = vmatprep.subr.bf16.mxu0 %v2028_v4 }
 0x432   : > { %1722 = vmatpush3.bf16.msra.mxu0 %v2270_v23 }
 0x433   : > { %1723 = vmatprep.subr.bf16.mxu0 %v2028_v4 }
 0x436   : > { %1725 = vmatpush3.bf16.msra.mxu0 %v2276_v26 }
 0x4ec   : > { %v639_v57 = vpop.f32.mrb[4].mxu0 }
 0x4ed   : > { %v640_v58 = vadd.f32 %v1079_v56, %v639_v57  ;;  %v1417_v59 = vpop.f32.mrb[5].mxu0 }
 0x4ef   : > { %1858 = vtanh.f32 %v640_v58 }
 0x4f9   : > { %v1859_v61 = vpop.eup %1858 }
 0x4fa   : > { %v649_v62 = vsel %vm648_vm5, %v1859_v61, %v570_v55 }
 0x4fb   : > { %1451 = vmatmul.mubr.f32.vlgmr.msra.gmra.mrb[4].mxu1 %v649_v62 }
 0x4fc   : > { %1728 = vmatpush3.bf16.msra.mxu1 %v2232_v5  ;;  %1520 = vmatprep.mubr.msk.f32.mxu1 %vm2029_vm0, %v2030_v7 }
 0x4fd   : > { %1729 = vmatprep.subr.bf16.mxu1 %v2028_v4 }
 0x500   : > { %1731 = vmatpush3.bf16.msra.mxu1 %v2240_v8 }
 0x501   : > { %1732 = vmatprep.subr.bf16.mxu1 %v2028_v4 }
 0x504   : > { %1734 = vmatpush3.bf16.msra.mxu1 %v2246_v11 }
 0x505   : > { %1735 = vmatprep.subr.bf16.mxu1 %v2028_v4 }
 0x508   : > { %1737 = vmatpush3.bf16.msra.mxu1 %v2252_v14 }
 0x509   : > { %1738 = vmatprep.subr.bf16.mxu1 %v2028_v4 }
 0x50c   : > { %1740 = vmatpush3.bf16.msra.mxu1 %v2258_v17  ;;  %v884_v17 = vstv %s883_s11 }
 0x50d   : > { %1741 = vmatprep.subr.bf16.mxu1 %v2028_v4  ;;  %vm885_vm8 = vcmp.eq.s32.totalorder %v884_v17, 1 }
 0x510   : > { %1743 = vmatpush3.bf16.msra.mxu1 %v2264_v20  ;;  %v892_v20 = vld [vmem:[#allocation8] sm:$0xff] (!%p1083_p2) }
 0x511   : > { %1744 = vmatprep.subr.bf16.mxu1 %v2028_v4  ;;  %v1751_v24 = vpack.c.bf16 (!%p1083_p2), %v893_v21, %v892_v20 }
 0x514   : > { %1746 = vmatpush3.bf16.msra.mxu1 %v2270_v23  ;;  %v2031_v23 = vmov (!%p1083_p2), 0.0|0.0  }
 0x515   : > { %1747 = vmatprep.subr.bf16.mxu1 %v2028_v4  ;;  %v1081_v4 = vld [vmem:[%s2219_s27 + $0x30] sm:$0xff]  ;;  %1750 = vmatprep.subr.bf16.mxu0 (!%p1083_p2), %v2031_v23 }
 0x518   : > { %1749 = vmatpush3.bf16.msra.mxu1 %v2276_v26  ;;  %v2033_v26 = vmov (!%p1083_p2), 0.0  }
 0x5ce   : > { %v718_v0 = vpop.f32.mrb[4].mxu1 }
 0x5cf   : > { %v719_v1 = vadd.f32 %v1080_v63, %v718_v0  ;;  %v1452_v2 = vpop.f32.mrb[5].mxu1 }
 0x5d1   : > { %1860 = vtanh.f32 %v719_v1 }
 0x5db   : > { %v1861_v5 = vpop.eup %1860 }
 0x5dc   : > { %v728_v6 = vsel %vm727_vm6, %v1861_v5, %v649_v62 }
 0x5dd   : > { %1486 = vmatmul.mubr.f32.vlgmr.msra.gmra.mrb[6].mxu0 %v728_v6 }
 0x5de   : > { %1555 = vmatprep.mubr.msk.f32.mxu0 (!%p1083_p2), %vm2032_vm9, %v2033_v26  ;;  %1752 = vmatpush3.bf16.msra.mxu0 (!%p1083_p2), %v1751_v24 }
 0x5df   : > { %1753 = vmatprep.subr.bf16.mxu0 (!%p1083_p2), %v2031_v23 }
 0x5e2   : > { %1755 = vmatpush3.bf16.msra.mxu0 (!%p1083_p2), %v1754_v27 }
 0x5e3   : > { %1756 = vmatprep.subr.bf16.mxu0 (!%p1083_p2), %v2031_v23 }
 0x5e6   : > { %1758 = vmatpush3.bf16.msra.mxu0 (!%p1083_p2), %v1757_v30 }
 0x5e7   : > { %1759 = vmatprep.subr.bf16.mxu0 (!%p1083_p2), %v2031_v23 }
 0x5ea   : > { %1761 = vmatpush3.bf16.msra.mxu0 (!%p1083_p2), %v1760_v33 }
 0x5eb   : > { %1762 = vmatprep.subr.bf16.mxu0 (!%p1083_p2), %v2031_v23 }
 0x5ee   : > { %1764 = vmatpush3.bf16.msra.mxu0 (!%p1083_p2), %v1763_v36 }
 0x5ef   : > { %1765 = vmatprep.subr.bf16.mxu0 (!%p1083_p2), %v2031_v23 }
 0x5f2   : > { %1767 = vmatpush3.bf16.msra.mxu0 (!%p1083_p2), %v1766_v39 }
 0x5f3   : > { %1768 = vmatprep.subr.bf16.mxu0 (!%p1083_p2), %v2031_v23 }
 0x5f6   : > { %1770 = vmatpush3.bf16.msra.mxu0 (!%p1083_p2), %v1769_v42 }
 0x5f7   : > { %1771 = vmatprep.subr.bf16.mxu0 (!%p1083_p2), %v2031_v23 }
 0x5fa   : > { %1773 = vmatpush3.bf16.msra.mxu0 (!%p1083_p2), %v1772_v45 }
 0x6b0   : > { %v797_v7 = vpop.f32.mrb[6].mxu0 }
 0x6b1   : > { %v798_v8 = vadd.f32 %v1081_v4, %v797_v7  ;;  %v1487_v9 = vpop.f32.mrb[7].mxu0 }
 0x6b3   : > { %1862 = vtanh.f32 %v798_v8 }
 0x6bd   : > { %v1863_v11 = vpop.eup %1862 }
 0x6be   : > { %v807_v12 = vsel %vm806_vm7, %v1863_v11, %v728_v6 }
 0x6bf   : > { %1521 = vmatmul.mubr.f32.vlgmr.msra.gmra.mrb[6].mxu1 %v807_v12 }
 0x792   : > { %v876_v14 = vpop.f32.mrb[6].mxu1 }
 0x793   : > { %v877_v15 = vadd.f32 %v1082_v13, %v876_v14  ;;  %v1522_v16 = vpop.f32.mrb[7].mxu1 }
 0x795   : > { %1864 = vtanh.f32 %v877_v15 }
 0x79b   : > { %891 = sbr.rel (%p1083_p2) target bundleno = 2168 (0x878), region = 56 }
 0x79f   : > { %v1865_v18 = vpop.eup %1864 }
 0x7a0   : > { %v886_v19 = vsel %vm885_vm8, %v1865_v18, %v807_v12 }
 0x7a1   : > { %887 = vst [vmem:[#allocation2] sm:$0xff] %v886_v19  ;;  %1556 = vmatmul.mubr.f32.vlgmr.msra.gmra.mrb[0].mxu0 (!%p1083_p2), %v886_v19 }
 0x874   : > { %v981_v47 = vpop.f32.mrb[0].mxu0 }
 0x875   : > { %v982_v48 = vadd.f32 %v1084_v46, %v981_v47  ;;  %v1557_v49 = vpop.f32.mrb[1].mxu0 }
 0x877   : > { %985 = vst [vmem:[#allocation9] sm:$0xff] %v982_v48 }
 0x878 PF: > { %p1804_p11 = scmp.eq.s32.totalorder %s2079_s19, 2  ;;  %s2034_s14 = smov [#allocation9]  }
 0x879   : > { %s993_s26 = sshll.u32 %s2034_s14, 4  ;;  %s994_s26 = int_to_ptr.vmem [resolvable:$true] %s993_s26 }
 0x87a   : > { %s1952_s27 = scalar_lea.vmem %s994_s26, 128  ;;  %p1959_p7 = scmp.lt.s32.totalorder %s994_s26, %s994_s26 }
 0x87b   : > { %p1953_p13 = scmp.ne.s32.totalorder %s994_s26, %s1952_s27  ;;  %p1960_p10 = scmp.lt.s32.totalorder %s1952_s27, %s1952_s27 }
 0x87d   : > { %p1954_p3 = pnand %p1953_p13, %p1804_p11  ;;  %p1961_p1 = por %p1960_p10, %p1959_p7 }
 0x87f   : > { %p1955_p8 = pneg %p1954_p3 }
 0x881   : > { %p1962_p4 = pnand %p1961_p1, %p1955_p8 }
 0x883   : > { %1965 = shalt.err (!%p1962_p4)
}
 0x884   : > { %s1966_s9 = scalar_lea.hbm %s2454_s4, 128 }
 0x885   : > { %p1967_p5 = scmp.ne.s32.totalorder %s2454_s4, %s1966_s9  ;;  %p1972_p12 = scmp.lt.u32.totalorder %s1966_s9, %s2454_s4 }
 0x887   : > { %p1968_p6 = pnand %p1967_p5, %p1804_p11 }
 0x889   : > { %p1969_p9 = pneg %p1968_p6 }
 0x88b   : > { %p1974_p0 = pnand %p1972_p12, %p1969_p9 }
 0x88d   : > { %1977 = shalt.err (!%p1974_p0)
}
 0x88e   : > { %1785 = dma.vmem_to_hbm [thread:$0]  (%p1804_p11), %s994_s26, 128, %s2454_s4, [#allocation5]  }
 0x88f   : > { %2003 = dma.done.wait (%p1804_p11), [#allocation5], 128  }
 0x890   : > { %2005 = vsyncadd (%p1804_p11), [#allocation5], 4294967168 }
 0x891 PF: > { %p16_p2 = scmp.ge.s32.totalorder %s2160_s5, 5   ;;  %s2467_s15 = smov %s2012_s16 }
 0x892   : > { %s2468_s16 = smov %s2016_s17  ;;  %s2469_s17 = smov %s2171_s8 }
 0x893   : > { %s2470_s18 = smov %s2160_s5  ;;  %18 = sbr.rel (!%p16_p2) target bundleno = 5 (0x5), region = 96 }
 0x89a   :  { %1006 = vsyncpa [#allocation4], 1 }
 0x89b   :  { %1008 = vsyncpa [#allocation4 + $0x1], 1 }
 0x89c   :  { %1009 = vsyncpa [#allocation7], 1 }
 0x89d   :  { %1010 = vsyncpa [#allocation5], 1 }
 0x89e   :  { %1012 = vsyncpa [#allocation5 + $0x1], 1 }

</bundles_post_ra>
